<compile_context>
chip_gen: v5e
topology: v5e:2x2
jax: 0.10.0
libtpu: 0.0.40
codegen_flags: <defaults>
</compile_context>

<pallas_src>
import jax
import jax.numpy as jnp
from jax import lax
from jax.experimental import pallas as pl
from jax.experimental.pallas import tpu as pltpu

LANE = 128
SUBLANE = 8
_LOG2 = 0.6931471805599453


def _round_up(x, m):
    return ((x + m - 1) // m) * m


# ----------------------------------------------------------------------------
# Kernel 1: MVGRLDiscriminator
#   block = Linear->ReLU->Linear->ReLU->Linear->ReLU ;  out = block(x) + Linear(x)
#   The first Linear and the jump Linear are fused into a single (D, 2D) matmul.
# ----------------------------------------------------------------------------
def _disc_kernel(x_ref, w1j_ref, b1j_ref, w2_ref, b2_ref, w3_ref, b3_ref, o_ref):
    dp = w2_ref.shape[0]
    x = x_ref[...]
    # One MXU pass over x produces both the layer-1 pre-activation and the jump.
    y = jnp.dot(x, w1j_ref[...], preferred_element_type=jnp.float32) + b1j_ref[...]
    h = jnp.maximum(y[:, :dp], 0.0)
    jump = y[:, dp:]
    h = jnp.maximum(
        jnp.dot(h, w2_ref[...], preferred_element_type=jnp.float32) + b2_ref[...], 0.0)
    h = jnp.maximum(
        jnp.dot(h, w3_ref[...], preferred_element_type=jnp.float32) + b3_ref[...], 0.0)
    o_ref[...] = (h + jump).astype(o_ref.dtype)


def pack_disc_params(p, d, dp):
    """Pad weights/biases to lane-dense (dp x dp) once and fuse [w1 | wj]."""
    def pad_w(w):
        return jnp.zeros((dp, dp), jnp.float32).at[:d, :d].set(w)

    def pad_b(b):
        return jnp.zeros((1, dp), jnp.float32).at[:, :d].set(b.reshape(1, d))

    w1, wj = pad_w(p["w1"]), pad_w(p["wj"])
    b1, bj = pad_b(p["b1"]), pad_b(p["bj"])
    return {
        "w1j": jnp.concatenate([w1, wj], axis=1),   # (dp, 2*dp)
        "b1j": jnp.concatenate([b1, bj], axis=1),   # (1, 2*dp)
        "w2": pad_w(p["w2"]), "b2": pad_b(p["b2"]),
        "w3": pad_w(p["w3"]), "b3": pad_b(p["b3"]),
        "d": d, "dp": dp,
    }


def discriminator(x, packed, *, out_padded=False, block_rows=256):
    """MVGRLDiscriminator.forward.  Returns (n, d) (or (n, dp) if out_padded)."""
    n = x.shape[0]
    d, dp = packed["d"], packed["dp"]

    tm = min(block_rows, _round_up(n, SUBLANE))
    n_pad = _round_up(n, tm)
    x_pad = jnp.zeros((n_pad, dp), jnp.float32).at[:n, :x.shape[1]].set(
        x.astype(jnp.float32))

    row_spec = pl.BlockSpec((tm, dp), lambda i: (i, 0))
    pin = lambda shape: pl.BlockSpec(shape, lambda i: (0, 0))  # weights resident

    flops = 8 * n_pad * dp * dp  # (2dp + dp + dp) contractions, 2 flops/MAC
    bytes_accessed = 4 * (2 * n_pad * dp + 4 * dp * dp + 4 * dp)

    out = pl.pallas_call(
        _disc_kernel,
        out_shape=jax.ShapeDtypeStruct((n_pad, dp), jnp.float32),
        grid=(n_pad // tm,),
        in_specs=[
            row_spec,
            pin((dp, 2 * dp)), pin((1, 2 * dp)),
            pin((dp, dp)), pin((1, dp)),
            pin((dp, dp)), pin((1, dp)),
        ],
        out_specs=row_spec,
        compiler_params=pltpu.CompilerParams(
            dimension_semantics=("parallel",),
            vmem_limit_bytes=32 * 1024 * 1024,
        ),
        cost_estimate=pl.CostEstimate(
            flops=flops, transcendentals=0, bytes_accessed=bytes_accessed),
    )(x_pad, packed["w1j"], packed["b1j"], packed["w2"], packed["b2"],
      packed["w3"], packed["b3"])

    if out_padded:
        return out[:n, :]
    return out[:n, :d]


# ----------------------------------------------------------------------------
# Kernel 2: fused similarity + pos/neg masking + JSD reduction for BOTH view
# pairs.  Emits a single (1,1) scalar: jsd(lh1,gh2) + jsd(lh2,gh1).
# gh is passed pre-transposed as [D, G] so the contraction is a plain matmul.
# ----------------------------------------------------------------------------
def _contrast_loss_kernel(lh1_ref, lh2_ref, gh2t_ref, gh1t_ref, bgid_ref, o_ref):
    sim1 = jnp.dot(lh1_ref[...], gh2t_ref[...], preferred_element_type=jnp.float32)
    sim2 = jnp.dot(lh2_ref[...], gh1t_ref[...], preferred_element_type=jnp.float32)
    n, g = sim1.shape

    col_ids = lax.broadcasted_iota(jnp.int32, (n, g), 1)
    pos_mask = (bgid_ref[...] == col_ids).astype(jnp.float32)   # bgid: (n, 1)
    inv_count = 1.0 / float(n * g)

    def softplus(t):
        return jnp.log(1.0 + jnp.exp(-jnp.abs(t))) + jnp.maximum(t, 0.0)

    def jsd(sim):
        pos = sim * pos_mask
        neg = sim - pos                       # == sim * (1 - pos_mask)
        e_pos = _LOG2 - softplus(-pos)
        e_neg = softplus(-neg) + neg - _LOG2
        return (jnp.sum(e_neg, keepdims=True)
                - jnp.sum(e_pos, keepdims=True)) * inv_count     # (1, 1)

    o_ref[...] = jsd(sim1) + jsd(sim2)


def contrast_loss(lh1, lh2, gh1, gh2, batch_graph_id):
    n, dp = lh1.shape
    g = gh1.shape[0]
    vmem = pl.BlockSpec(memory_space=pltpu.MemorySpace.VMEM)
    out = pl.pallas_call(
        _contrast_loss_kernel,
        out_shape=jax.ShapeDtypeStruct((1, 1), jnp.float32),
        in_specs=[vmem] * 5,
        out_specs=vmem,
        cost_estimate=pl.CostEstimate(
            flops=4 * n * dp * g + 32 * n * g,
            transcendentals=8 * n * g,
            bytes_accessed=4 * (2 * n * dp + 2 * dp * g + n + 1),
        ),
    )(lh1, lh2, gh2.T, gh1.T, batch_graph_id.reshape(n, 1).astype(jnp.int32))
    return out[0, 0]


# ----------------------------------------------------------------------------
# MVGRLContrast.forward_graph
# TODO(synk): the loss module is injected in the PyTorch code; the standard
# MVGRL/DGI JSD loss (mean over all N*G masked entries) is used here, matching
# the previous version's semantics.
# ----------------------------------------------------------------------------
def mvgrl_contrast_graph(params, h1, h2, g_h1, g_h2, batch_graph_id):
    n = h1.shape[0]
    g = g_h1.shape[0]

    # Batch the two views that share weights -> 2 discriminator launches total.
    lh = discriminator(jnp.concatenate([h1, h2], axis=0),
                       params["local_packed"], out_padded=True)
    gh = discriminator(jnp.concatenate([g_h1, g_h2], axis=0),
                       params["global_packed"], out_padded=True)
    lh1, lh2 = lh[:n], lh[n:]
    gh1, gh2 = gh[:g], gh[g:]

    return contrast_loss(lh1, lh2, gh1, gh2, batch_graph_id)


# ----------------------------------------------------------------------------
# Deterministic parameter init (nn.Linear-style uniform(-1/sqrt(D), 1/sqrt(D)))
# ----------------------------------------------------------------------------
def init_disc_params(key, d):
    ks = jax.random.split(key, 8)
    s = 1.0 / jnp.sqrt(jnp.float32(d))

    def u(k, shape):
        return jax.random.uniform(k, shape, jnp.float32, -s, s)

    return {
        "w1": u(ks[0], (d, d)), "b1": u(ks[1], (1, d)),
        "w2": u(ks[2], (d, d)), "b2": u(ks[3], (1, d)),
        "w3": u(ks[4], (d, d)), "b3": u(ks[5], (1, d)),
        "wj": u(ks[6], (d, d)), "bj": u(ks[7], (1, d)),
    }


# ----------------------------------------------------------------------------
# Pure-JAX reference (for a loose sanity check).
# ----------------------------------------------------------------------------
def _disc_ref(x, p):
    h = jnp.maximum(x @ p["w1"] + p["b1"], 0.0)
    h = jnp.maximum(h @ p["w2"] + p["b2"], 0.0)
    h = jnp.maximum(h @ p["w3"] + p["b3"], 0.0)
    return h + (x @ p["wj"] + p["bj"])


def _loss_ref(p_local, p_global, h1, h2, g_h1, g_h2, bgid):
    lh1, lh2 = _disc_ref(h1, p_local), _disc_ref(h2, p_local)
    gh1, gh2 = _disc_ref(g_h1, p_global), _disc_ref(g_h2, p_global)

    def jsd(lh, gh):
        sim = lh @ gh.T
        n, g = sim.shape
        mask = (bgid[:, None] == jnp.arange(g)[None, :]).astype(jnp.float32)
        pos, neg = sim * mask, sim * (1.0 - mask)
        e_pos = jnp.log(2.0) - jax.nn.softplus(-pos)
        e_neg = jax.nn.softplus(-neg) + neg - jnp.log(2.0)
        return jnp.mean(e_neg) - jnp.mean(e_pos)

    return jsd(lh1, gh2) + jsd(lh2, gh1)


if __name__ == "__main__":
    D = 32        # embed_dim
    N = 16        # number of nodes
    G = 2         # number of graphs in the batch
    DP = max(_round_up(D, LANE), LANE)

    root = jax.random.PRNGKey(0)
    k_local, k_global, k_h1, k_h2, k_g1, k_g2 = jax.random.split(root, 6)

    raw_local = init_disc_params(k_local, D)
    raw_global = init_disc_params(k_global, D)
    params = {
        "local_packed": pack_disc_params(raw_local, D, DP),
        "global_packed": pack_disc_params(raw_global, D, DP),
    }

    h1 = jax.random.normal(k_h1, (N, D), jnp.float32)
    h2 = jax.random.normal(k_h2, (N, D), jnp.float32)
    g_h1 = jax.random.normal(k_g1, (G, D), jnp.float32)
    g_h2 = jax.random.normal(k_g2, (G, D), jnp.float32)
    batch_graph_id = jnp.concatenate(
        [jnp.zeros((N // 2,), jnp.int32), jnp.ones((N - N // 2,), jnp.int32)]
    )

    # Standalone MVGRLDiscriminator forward (matches the PyTorch module).
    disc_out = discriminator(h1, params["local_packed"])
    assert disc_out.shape == (N, D)

    # Full MVGRL graph-level contrast forward.
    loss = mvgrl_contrast_graph(params, h1, h2, g_h1, g_h2, batch_graph_id)
    jax.block_until_ready((disc_out, loss))

    # Loose correctness checks against pure JAX (tolerant of MXU precision).
    ref_out = _disc_ref(h1, raw_local)
    ref_loss = _loss_ref(raw_local, raw_global, h1, h2, g_h1, g_h2, batch_graph_id)
    assert jnp.isfinite(loss)
    assert jnp.allclose(disc_out, ref_out, rtol=1e-2, atol=1e-2)
    assert jnp.allclose(loss, ref_loss, rtol=1e-2, atol=1e-2)

    print("KERNEL_OK")
</pallas_src>

<mosaic_0001>
module attributes {stable_mosaic.version = 11 : i64} {
  func.func @_disc_kernel(%arg0: i32, %arg1: memref<16x128xf32, #tpu.memory_space<vmem>>, %arg2: memref<128x256xf32, #tpu.memory_space<vmem>>, %arg3: memref<1x256xf32, #tpu.memory_space<vmem>>, %arg4: memref<128x128xf32, #tpu.memory_space<vmem>>, %arg5: memref<1x128xf32, #tpu.memory_space<vmem>>, %arg6: memref<128x128xf32, #tpu.memory_space<vmem>>, %arg7: memref<1x128xf32, #tpu.memory_space<vmem>>, %arg8: memref<16x128xf32, #tpu.memory_space<vmem>>) attributes {dimension_semantics = [#tpu.dimension_semantics<parallel>], iteration_bounds = array<i64: 1>, scalar_prefetch = 0 : i64, scratch_operands = 0 : i64, tpu.core_type = #tpu.core_type<tc>, window_params = [{transform_indices = @transform_0, window_bounds = array<i64: 16, 128>}, {pipeline_mode = #tpu.pipeline_mode<synchronous>, transform_indices = @transform_1, window_bounds = array<i64: 128, 256>}, {pipeline_mode = #tpu.pipeline_mode<synchronous>, transform_indices = @transform_2, window_bounds = array<i64: 1, 256>}, {pipeline_mode = #tpu.pipeline_mode<synchronous>, transform_indices = @transform_3, window_bounds = array<i64: 128, 128>}, {pipeline_mode = #tpu.pipeline_mode<synchronous>, transform_indices = @transform_4, window_bounds = array<i64: 1, 128>}, {pipeline_mode = #tpu.pipeline_mode<synchronous>, transform_indices = @transform_5, window_bounds = array<i64: 128, 128>}, {pipeline_mode = #tpu.pipeline_mode<synchronous>, transform_indices = @transform_6, window_bounds = array<i64: 1, 128>}, {transform_indices = @transform_7, window_bounds = array<i64: 16, 128>}]} {
    %c0 = arith.constant 0 : index
    %c0_0 = arith.constant 0 : index
    %0 = vector.load %arg1[%c0, %c0_0] : memref<16x128xf32, #tpu.memory_space<vmem>>, vector<16x128xf32>
    %c0_1 = arith.constant 0 : index
    %c0_2 = arith.constant 0 : index
    %1 = vector.load %arg2[%c0_1, %c0_2] : memref<128x256xf32, #tpu.memory_space<vmem>>, vector<128x256xf32>
    %cst = arith.constant dense<0.000000e+00> : vector<16x256xf32>
    %2 = tpu.matmul %0, %1, %cst {dimension_numbers = #tpu.dot_dimension_numbers<[1], [0], [0], [1], [0, 0, 1, 1], [], []>} : vector<16x128xf32>, vector<128x256xf32>, vector<16x256xf32> -> vector<16x256xf32>
    %c0_3 = arith.constant 0 : index
    %c0_4 = arith.constant 0 : index
    %3 = vector.load %arg3[%c0_3, %c0_4] : memref<1x256xf32, #tpu.memory_space<vmem>>, vector<1x256xf32>
    %4 = vector.broadcast %3 : vector<1x256xf32> to vector<16x256xf32>
    %5 = arith.addf %2, %4 : vector<16x256xf32>
    %6 = vector.extract_strided_slice %5 {offsets = [0, 0], sizes = [16, 128], strides = [1, 1]} : vector<16x256xf32> to vector<16x128xf32>
    %cst_5 = arith.constant 0.000000e+00 : f32
    %7 = vector.broadcast %cst_5 : f32 to vector<16x128xf32>
    %8 = arith.maximumf %6, %7 : vector<16x128xf32>
    %9 = vector.extract_strided_slice %5 {offsets = [0, 128], sizes = [16, 128], strides = [1, 1]} : vector<16x256xf32> to vector<16x128xf32>
    %c0_6 = arith.constant 0 : index
    %c0_7 = arith.constant 0 : index
    %10 = vector.load %arg4[%c0_6, %c0_7] : memref<128x128xf32, #tpu.memory_space<vmem>>, vector<128x128xf32>
    %cst_8 = arith.constant dense<0.000000e+00> : vector<16x128xf32>
    %11 = tpu.matmul %8, %10, %cst_8 {dimension_numbers = #tpu.dot_dimension_numbers<[1], [0], [0], [1], [0, 0, 1, 1], [], []>} : vector<16x128xf32>, vector<128x128xf32>, vector<16x128xf32> -> vector<16x128xf32>
    %c0_9 = arith.constant 0 : index
    %c0_10 = arith.constant 0 : index
    %12 = vector.load %arg5[%c0_9, %c0_10] : memref<1x128xf32, #tpu.memory_space<vmem>>, vector<1x128xf32>
    %13 = vector.broadcast %12 : vector<1x128xf32> to vector<16x128xf32>
    %14 = arith.addf %11, %13 : vector<16x128xf32>
    %cst_11 = arith.constant 0.000000e+00 : f32
    %15 = vector.broadcast %cst_11 : f32 to vector<16x128xf32>
    %16 = arith.maximumf %14, %15 : vector<16x128xf32>
    %c0_12 = arith.constant 0 : index
    %c0_13 = arith.constant 0 : index
    %17 = vector.load %arg6[%c0_12, %c0_13] : memref<128x128xf32, #tpu.memory_space<vmem>>, vector<128x128xf32>
    %cst_14 = arith.constant dense<0.000000e+00> : vector<16x128xf32>
    %18 = tpu.matmul %16, %17, %cst_14 {dimension_numbers = #tpu.dot_dimension_numbers<[1], [0], [0], [1], [0, 0, 1, 1], [], []>} : vector<16x128xf32>, vector<128x128xf32>, vector<16x128xf32> -> vector<16x128xf32>
    %c0_15 = arith.constant 0 : index
    %c0_16 = arith.constant 0 : index
    %19 = vector.load %arg7[%c0_15, %c0_16] : memref<1x128xf32, #tpu.memory_space<vmem>>, vector<1x128xf32>
    %20 = vector.broadcast %19 : vector<1x128xf32> to vector<16x128xf32>
    %21 = arith.addf %18, %20 : vector<16x128xf32>
    %cst_17 = arith.constant 0.000000e+00 : f32
    %22 = vector.broadcast %cst_17 : f32 to vector<16x128xf32>
    %23 = arith.maximumf %21, %22 : vector<16x128xf32>
    %24 = arith.addf %23, %9 : vector<16x128xf32>
    %c0_18 = arith.constant 0 : index
    %c0_19 = arith.constant 0 : index
    %25 = vector.load %arg8[%c0_18, %c0_19] : memref<16x128xf32, #tpu.memory_space<vmem>>, vector<16x128xf32>
    tpu.vector_store %arg8[%c0_18, %c0_19], %24 {strides = array<i32>} : memref<16x128xf32, #tpu.memory_space<vmem>>, vector<16x128xf32>,
    return
  }
  func.func @transform_0(%arg0: i32) -> (i32, i32) {
    %c0_i32 = arith.constant 0 : i32
    %c0_i32_0 = arith.constant 0 : i32
    return %arg0, %c0_i32 : i32, i32
  }
  func.func @transform_1(%arg0: i32) -> (i32, i32) {
    %c0_i32 = arith.constant 0 : i32
    %c0_i32_0 = arith.constant 0 : i32
    %c0_i32_1 = arith.constant 0 : i32
    return %c0_i32, %c0_i32_0 : i32, i32
  }
  func.func @transform_2(%arg0: i32) -> (i32, i32) {
    %c0_i32 = arith.constant 0 : i32
    %c0_i32_0 = arith.constant 0 : i32
    %c0_i32_1 = arith.constant 0 : i32
    return %c0_i32, %c0_i32_0 : i32, i32
  }
  func.func @transform_3(%arg0: i32) -> (i32, i32) {
    %c0_i32 = arith.constant 0 : i32
    %c0_i32_0 = arith.constant 0 : i32
    %c0_i32_1 = arith.constant 0 : i32
    return %c0_i32, %c0_i32_0 : i32, i32
  }
  func.func @transform_4(%arg0: i32) -> (i32, i32) {
    %c0_i32 = arith.constant 0 : i32
    %c0_i32_0 = arith.constant 0 : i32
    %c0_i32_1 = arith.constant 0 : i32
    return %c0_i32, %c0_i32_0 : i32, i32
  }
  func.func @transform_5(%arg0: i32) -> (i32, i32) {
    %c0_i32 = arith.constant 0 : i32
    %c0_i32_0 = arith.constant 0 : i32
    %c0_i32_1 = arith.constant 0 : i32
    return %c0_i32, %c0_i32_0 : i32, i32
  }
  func.func @transform_6(%arg0: i32) -> (i32, i32) {
    %c0_i32 = arith.constant 0 : i32
    %c0_i32_0 = arith.constant 0 : i32
    %c0_i32_1 = arith.constant 0 : i32
    return %c0_i32, %c0_i32_0 : i32, i32
  }
  func.func @transform_7(%arg0: i32) -> (i32, i32) {
    %c0_i32 = arith.constant 0 : i32
    %c0_i32_0 = arith.constant 0 : i32
    return %arg0, %c0_i32 : i32, i32
  }
}

</mosaic_0001>

<bundles_post_ra>
// kernel: tpu_custom_call.1
= control target key start
LH: loop header
LB: loop body
LE: loop exit
PB: predicated region body
PF: predicated region fallthrough
CT: control target
= control target key end

     0   :  { %12 = vsyncpa [#allocation3], 0  ;;  %s568_s0 = inlined_call_operand.hbm [shape: f32[16,128], index: 0, kind: input, shape index: {}]   ;;  %s569_s1 = inlined_call_operand.hbm [shape: f32[128,256], index: 1, kind: input, shape index: {}]   ;;  %s570_s2 = inlined_call_operand.hbm [shape: f32[1,256], index: 2, kind: input, shape index: {}]   ;;  %s571_s3 = inlined_call_operand.hbm [shape: f32[128,128], index: 3, kind: input, shape index: {}]   ;;  %s572_s4 = inlined_call_operand.vmem [shape: f32[1,128], index: 4, kind: input, shape index: {}]   ;;  %s573_s5 = inlined_call_operand.hbm [shape: f32[128,128], index: 5, kind: input, shape index: {}]   ;;  %s574_s6 = inlined_call_operand.vmem [shape: f32[1,128], index: 6, kind: input, shape index: {}]   ;;  %s575_s7 = inlined_call_operand.hbm [shape: f32[16,128], index: 7, kind: output, shape index: {}]  }
   0x1   :  { %13 = vsyncpa [#allocation6], 0 }
   0x2   :  { %14 = vsyncpa [#allocation9], 0  ;;  %s33_s26 = sshll.u32 %s569_s1, 4  ;;  %s34_s26 = int_to_ptr.hbm [resolvable:$true] %s33_s26 }
   0x3   :  { %15 = vsyncpa [#allocation4], 0  ;;  %s470_s27 = smov [#allocation5]   ;;  %s471_s29 = smov 256  }
   0x4   :  { %s35_s28 = sshll.u32 %s470_s27, 4  ;;  %s472_s30 = smov 16   ;;  %s36_s28 = int_to_ptr.vmem [resolvable:$true] %s35_s28 }
   0x5   :  { %41 = dma.hbm_to_vmem [thread:$0]  %s34_s26, 4096, %s36_s28, [#allocation6], %s471_s29, %s471_s29, %s472_s30  }
   0x6   :  { %s57_s10 = sshll.u32 %s571_s3, 4  ;;  %s473_s11 = smov [#allocation8]   ;;  %s58_s10 = int_to_ptr.hbm [resolvable:$true] %s57_s10 }
   0x7   :  { %s59_s12 = sshll.u32 %s473_s11, 4  ;;  %s20_s15 = sshll.u32 %s568_s0, 4  ;;  %s60_s12 = int_to_ptr.vmem [resolvable:$true] %s59_s12  ;;  %s21_s15 = int_to_ptr.hbm [resolvable:$true] %s20_s15 }
   0x8   :  { %s474_s1 = smov 128   ;;  %s475_s16 = smov 8  }
   0x9   :  { %65 = dma.hbm_to_vmem [thread:$0]  %s58_s10, 2048, %s60_s12, [#allocation9], %s474_s1, %s474_s1, %s475_s16  }
   0xa   :  { %s47_s19 = sshll.u32 %s570_s2, 4  ;;  %s476_s3 = smov [#allocation2]   ;;  %s48_s19 = int_to_ptr.hbm [resolvable:$true] %s47_s19 }
   0xb   :  { %s22_s20 = sshll.u32 %s476_s3, 4  ;;  %s477_s0 = smov [#allocation7]   ;;  %s23_s20 = int_to_ptr.vmem [resolvable:$true] %s22_s20 }
   0xc   :  { %28 = dma.hbm_to_vmem [thread:$0]  %s21_s15, 256, %s23_s20, [#allocation3], %s474_s1, %s474_s1, %s475_s16  }
   0xd   :  { %s49_s21 = sshll.u32 %s477_s0, 4  ;;  %s72_s24 = sshll.u32 %s573_s5, 4  ;;  %s50_s21 = int_to_ptr.vmem [resolvable:$true] %s49_s21  ;;  %s73_s24 = int_to_ptr.hbm [resolvable:$true] %s72_s24 }
   0xe   :  { %52 = dma.hbm_to_vmem [thread:$0]  %s48_s19, 32, %s50_s21, [#allocation6]  }
   0xf   :  { %s478_s25 = smov [#allocation10]  }
  0x10   :  { %s74_s26 = sshll.u32 %s478_s25, 4  ;;  %s75_s26 = int_to_ptr.vmem [resolvable:$true] %s74_s26 }
  0x11   :  { %80 = dma.hbm_to_vmem [thread:$0]  %s73_s24, 2048, %s75_s26, [#allocation9], %s474_s1, %s474_s1, %s475_s16  }
  0x12   :  { %462 = dma.done.wait [#allocation3], 256  }
  0x13   :  { %463 = vsyncadd [#allocation3], 4294967040 }
  0x14   :  { %464 = dma.done.wait [#allocation6], 4128  }
  0x15   :  { %465 = vsyncadd [#allocation6], 4294963168 }
  0x16   :  { %466 = dma.done.wait [#allocation9], 4096  }
  0x17   :  { %467 = vsyncadd [#allocation9], 4294963200  ;;  %v135_v0 = vld [vmem:[#allocation5 + $0xf0] sm:$0xff]  ;;  %v133_v1 = vld [vmem:[#allocation5 + $0xe0] sm:$0xff]  ;;  %s291_s9 = sshll.u32 %s575_s7, 4  ;;  %s292_s9 = int_to_ptr.hbm [resolvable:$true] %s291_s9 }
  0x18   :  { %143 = vmatpush.msra.mxu0 %v135_v0  ;;  %v131_v2 = vld [vmem:[#allocation5 + $0xd0] sm:$0xff]  ;;  %v129_v3 = vld [vmem:[#allocation5 + $0xc0] sm:$0xff]  ;;  %v547_v30 = vld [vmem:[#allocation2 + $0x8] sm:$0xff] }
  0x19   :  { %v127_v4 = vld [vmem:[#allocation5 + $0xb0] sm:$0xff]  ;;  %v125_v5 = vld [vmem:[#allocation5 + $0xa0] sm:$0xff]  ;;  %v136_v36 = vld [vmem:[#allocation5 + $0xf8] sm:$0xff] }
  0x1a   :  { %144 = vmatpush.msra.mxu0 %v133_v1  ;;  %v206_v6 = vld [vmem:[#allocation8 + $0x78] sm:$0xff]  ;;  %v205_v7 = vld [vmem:[#allocation8 + $0x70] sm:$0xff]  ;;  %v204_v9 = vld [vmem:[#allocation8 + $0x68] sm:$0xff]  ;;  %166 = vmatpush.msra.mxu1 %v136_v36 }
  0x1b   :  { %211 = vmatpush.msra.mxu2 %v206_v6  ;;  %v123_v8 = vld [vmem:[#allocation5 + $0x90] sm:$0xff]  ;;  %v121_v10 = vld [vmem:[#allocation5 + $0x80] sm:$0xff]  ;;  %v134_v38 = vld [vmem:[#allocation5 + $0xe8] sm:$0xff] }
  0x1c   :  { %145 = vmatpush.msra.mxu0 %v131_v2  ;;  %v203_v11 = vld [vmem:[#allocation8 + $0x60] sm:$0xff]  ;;  %v119_v12 = vld [vmem:[#allocation5 + $0x70] sm:$0xff]  ;;  %v202_v13 = vld [vmem:[#allocation8 + $0x58] sm:$0xff]  ;;  %167 = vmatpush.msra.mxu1 %v134_v38 }
  0x1d   :  { %212 = vmatpush.msra.mxu2 %v205_v7  ;;  %v117_v14 = vld [vmem:[#allocation5 + $0x60] sm:$0xff]  ;;  %v201_v15 = vld [vmem:[#allocation8 + $0x50] sm:$0xff]  ;;  %v200_v17 = vld [vmem:[#allocation8 + $0x48] sm:$0xff] }
  0x1e   :  { %146 = vmatpush.msra.mxu0 %v129_v3  ;;  %v115_v16 = vld [vmem:[#allocation5 + $0x50] sm:$0xff]  ;;  %v113_v18 = vld [vmem:[#allocation5 + $0x40] sm:$0xff]  ;;  %v132_v39 = vld [vmem:[#allocation5 + $0xd8] sm:$0xff] }
  0x1f   :  { %213 = vmatpush.msra.mxu2 %v204_v9  ;;  %v199_v19 = vld [vmem:[#allocation8 + $0x40] sm:$0xff]  ;;  %v111_v20 = vld [vmem:[#allocation5 + $0x30] sm:$0xff]  ;;  %v198_v21 = vld [vmem:[#allocation8 + $0x38] sm:$0xff]  ;;  %168 = vmatpush.msra.mxu1 %v132_v39 }
  0x20   :  { %147 = vmatpush.msra.mxu0 %v127_v4  ;;  %v109_v22 = vld [vmem:[#allocation5 + $0x20] sm:$0xff]  ;;  %v197_v23 = vld [vmem:[#allocation8 + $0x30] sm:$0xff]  ;;  %v196_v25 = vld [vmem:[#allocation8 + $0x28] sm:$0xff] }
  0x21   :  { %214 = vmatpush.msra.mxu2 %v203_v11  ;;  %v107_v24 = vld [vmem:[#allocation5 + $0x10] sm:$0xff]  ;;  %v105_v26 = vld [vmem:[#allocation5] sm:$0xff]  ;;  %v130_v41 = vld [vmem:[#allocation5 + $0xc8] sm:$0xff] }
  0x22   :  { %148 = vmatpush.msra.mxu0 %v125_v5  ;;  %v195_v27 = vld [vmem:[#allocation8 + $0x20] sm:$0xff]  ;;  %v544_v28 = vld [vmem:[#allocation2] sm:$0xff]  ;;  %v194_v29 = vld [vmem:[#allocation8 + $0x18] sm:$0xff]  ;;  %169 = vmatpush.msra.mxu1 %v130_v41 }
  0x23   :  { %215 = vmatpush.msra.mxu2 %v202_v13  ;;  %v193_v31 = vld [vmem:[#allocation8 + $0x10] sm:$0xff]  ;;  %v192_v32 = vld [vmem:[#allocation8 + $0x8] sm:$0xff]  ;;  %v191_v33 = vld [vmem:[#allocation8] sm:$0xff] }
  0x24   :  { %149 = vmatpush.msra.mxu0 %v123_v8  ;;  %v251_v34 = vld [vmem:[#allocation10 + $0x78] sm:$0xff]  ;;  %v250_v35 = vld [vmem:[#allocation10 + $0x70] sm:$0xff]  ;;  %v249_v37 = vld [vmem:[#allocation10 + $0x68] sm:$0xff] }
  0x25   :  { %216 = vmatpush.msra.mxu2 %v201_v15  ;;  %256 = vmatpush.msra.mxu3 %v251_v34  ;;  %v248_v40 = vld [vmem:[#allocation10 + $0x60] sm:$0xff]  ;;  %v247_v42 = vld [vmem:[#allocation10 + $0x58] sm:$0xff]  ;;  %v246_v44 = vld [vmem:[#allocation10 + $0x50] sm:$0xff] }
  0x26   :  { %150 = vmatpush.msra.mxu0 %v121_v10  ;;  %v128_v43 = vld [vmem:[#allocation5 + $0xb8] sm:$0xff]  ;;  %v126_v45 = vld [vmem:[#allocation5 + $0xa8] sm:$0xff]  ;;  %v550_v49 = vld [vmem:[#allocation7] sm:$0x3] }
  0x27   :  { %217 = vmatpush.msra.mxu2 %v200_v17  ;;  %257 = vmatpush.msra.mxu3 %v250_v35  ;;  %v245_v46 = vld [vmem:[#allocation10 + $0x48] sm:$0xff]  ;;  %v124_v47 = vld [vmem:[#allocation5 + $0x98] sm:$0xff]  ;;  %v244_v48 = vld [vmem:[#allocation10 + $0x40] sm:$0xff]  ;;  %v139_v53 = vperm.slane %v550_v49, 0 }
  0x28   :  { %151 = vmatpush.msra.mxu0 %v119_v12  ;;  %170 = vmatpush.msra.mxu1 %v128_v43  ;;  %v122_v50 = vld [vmem:[#allocation5 + $0x88] sm:$0xff]  ;;  %v243_v51 = vld [vmem:[#allocation10 + $0x38] sm:$0xff]  ;;  %v242_v54 = vld [vmem:[#allocation10 + $0x30] sm:$0xff] }
  0x29   :  { %218 = vmatpush.msra.mxu2 %v199_v19  ;;  %258 = vmatpush.msra.mxu3 %v249_v37  ;;  %v120_v52 = vld [vmem:[#allocation5 + $0x78] sm:$0xff]  ;;  %v118_v55 = vld [vmem:[#allocation5 + $0x68] sm:$0xff]  ;;  %v316_v10 = vld [vmem:[%s572_s4] ss:$0 sm:$0xff]  ;;  %v140_v19 = vperm.slane %v550_v49, 1  ;;  %s479_s4 = smov [#allocation11]  }
  0x2a   :  { %152 = vmatpush.msra.mxu0 %v117_v14  ;;  %171 = vmatpush.msra.mxu1 %v126_v45  ;;  %v241_v56 = vld [vmem:[#allocation10 + $0x28] sm:$0xff]  ;;  %v240_v59 = vld [vmem:[#allocation10 + $0x20] sm:$0xff]  ;;  %v239_v61 = vld [vmem:[#allocation10 + $0x18] sm:$0xff]  ;;  %s289_s29 = sshll.u32 %s479_s4, 4  ;;  %s290_s29 = int_to_ptr.vmem [resolvable:$true] %s289_s29 }
  0x2b   :  { %219 = vmatpush.msra.mxu2 %v198_v21  ;;  %259 = vmatpush.msra.mxu3 %v248_v40  ;;  %v238_v1 = vld [vmem:[#allocation10 + $0x10] sm:$0xff]  ;;  %v237_v3 = vld [vmem:[#allocation10 + $0x8] sm:$0xff]  ;;  %v236_v5 = vld [vmem:[#allocation10] sm:$0xff] }
  0x2c   :  { %153 = vmatpush.msra.mxu0 %v115_v16  ;;  %172 = vmatpush.msra.mxu1 %v124_v47  ;;  %v116_v2 = vld [vmem:[#allocation5 + $0x58] sm:$0xff]  ;;  %v114_v4 = vld [vmem:[#allocation5 + $0x48] sm:$0xff] }
  0x2d   :  { %220 = vmatpush.msra.mxu2 %v197_v23  ;;  %260 = vmatpush.msra.mxu3 %v247_v42  ;;  %v112_v6 = vld [vmem:[#allocation5 + $0x38] sm:$0xff]  ;;  %v110_v7 = vld [vmem:[#allocation5 + $0x28] sm:$0xff] }
  0x2e   :  { %154 = vmatpush.msra.mxu0 %v113_v18  ;;  %173 = vmatpush.msra.mxu1 %v122_v50  ;;  %v108_v8 = vld [vmem:[#allocation5 + $0x18] sm:$0xff]  ;;  %v106_v9 = vld [vmem:[#allocation5 + $0x8] sm:$0xff]  ;;  %v317_v18 = vld [vmem:[%s574_s6] ss:$0 sm:$0xff] }
  0x2f   :  { %221 = vmatpush.msra.mxu2 %v196_v25  ;;  %261 = vmatpush.msra.mxu3 %v246_v44 }
  0x30   :  { %155 = vmatpush.msra.mxu0 %v111_v20  ;;  %174 = vmatpush.msra.mxu1 %v120_v52 }
  0x31   :  { %222 = vmatpush.msra.mxu2 %v195_v27  ;;  %262 = vmatpush.msra.mxu3 %v245_v46 }
  0x32   :  { %156 = vmatpush.msra.mxu0 %v109_v22  ;;  %175 = vmatpush.msra.mxu1 %v118_v55 }
  0x33   :  { %223 = vmatpush.msra.mxu2 %v194_v29  ;;  %263 = vmatpush.msra.mxu3 %v244_v48 }
  0x34   :  { %157 = vmatpush.msra.mxu0 %v107_v24  ;;  %176 = vmatpush.msra.mxu1 %v116_v2 }
  0x35   :  { %224 = vmatpush.msra.mxu2 %v193_v31  ;;  %264 = vmatpush.msra.mxu3 %v243_v51 }
  0x36   :  { %158 = vmatpush.msra.mxu0 %v105_v26  ;;  %177 = vmatpush.msra.mxu1 %v114_v4 }
  0x37   :  { %159 = vmatmul.f32.vlgmr.msra.gmra.mxu0 %v544_v28  ;;  %225 = vmatpush.msra.mxu2 %v192_v32 }
  0x38   :  { %265 = vmatpush.msra.mxu3 %v242_v54  ;;  %178 = vmatpush.msra.mxu1 %v112_v6 }
  0x39   :  { %226 = vmatpush.msra.mxu2 %v191_v33 }
  0x3a   :  { %266 = vmatpush.msra.mxu3 %v241_v56  ;;  %179 = vmatpush.msra.mxu1 %v110_v7 }
  0x3c   :  { %267 = vmatpush.msra.mxu3 %v240_v59  ;;  %180 = vmatpush.msra.mxu1 %v108_v8 }
  0x3e   :  { %268 = vmatpush.msra.mxu3 %v239_v61  ;;  %181 = vmatpush.msra.mxu1 %v106_v9 }
  0x3f   :  { %162 = vmatmul.f32.gmra.mxu0 %v547_v30  ;;  %182 = vmatmul.f32.vlgmr.msra.gmra.mxu1 %v544_v28 }
  0x40   :  { %269 = vmatpush.msra.mxu3 %v238_v1 }
  0x42   :  { %270 = vmatpush.msra.mxu3 %v237_v3 }
  0x44   :  { %271 = vmatpush.msra.mxu3 %v236_v5 }
  0x47   :  { %185 = vmatmul.f32.gmra.mxu1 %v547_v30 }
  0xb4   :  { %v160_v57 = vpop.f32.mrf.mxu0 }
  0xb5   :  { %v161_v58 = vadd.f32 %v160_v57, %v139_v53 }
  0xb7   :  { %v189_v60 = vmax.f32 %v161_v58, 0.0 }
  0xb9   :  { %227 = vmatmul.f32.vlgmr.msra.gmra.mxu2 %v189_v60 }
  0xbc   :  { %v163_v62 = vpop.f32.mrf.mxu0  ;;  %v183_v17 = vpop.f32.mrf.mxu1 }
  0xbd   :  { %v164_v63 = vadd.f32 %v163_v62, %v139_v53  ;;  %v184_v22 = vadd.f32 %v183_v17, %v140_v19 }
  0xbf   :  { %v190_v0 = vmax.f32 %v164_v63, 0.0 }
  0xc1   :  { %230 = vmatmul.f32.gmra.mxu2 %v190_v0 }
  0xc4   :  { %v186_v25 = vpop.f32.mrf.mxu1 }
  0xc5   :  { %v187_v28 = vadd.f32 %v186_v25, %v140_v19 }
 0x13c   :  { %v228_v11 = vpop.f32.mrf.mxu2 }
 0x13d   :  { %v229_v12 = vadd.f32 %v316_v10, %v228_v11 }
 0x13f   :  { %v234_v13 = vmax.f32 %v229_v12, 0.0 }
 0x141   :  { %272 = vmatmul.f32.vlgmr.msra.gmra.mxu3 %v234_v13 }
 0x144   :  { %v231_v14 = vpop.f32.mrf.mxu2 }
 0x145   :  { %v232_v15 = vadd.f32 %v316_v10, %v231_v14 }
 0x147   :  { %v235_v16 = vmax.f32 %v232_v15, 0.0 }
 0x149   :  { %275 = vmatmul.f32.gmra.mxu3 %v235_v16 }
 0x1c4   :  { %v273_v20 = vpop.f32.mrf.mxu3 }
 0x1c5   :  { %v274_v21 = vadd.f32 %v317_v18, %v273_v20 }
 0x1c7   :  { %v279_v23 = vmax.f32 %v274_v21, 0.0 }
 0x1c9   :  { %v281_v24 = vadd.f32 %v279_v23, %v184_v22 }
 0x1cb   :  { %283 = vst [vmem:[#allocation11] sm:$0xff] %v281_v24 }
 0x1cc   :  { %v276_v26 = vpop.f32.mrf.mxu3 }
 0x1cd   :  { %v277_v27 = vadd.f32 %v317_v18, %v276_v26 }
 0x1cf   :  { %v280_v29 = vmax.f32 %v277_v27, 0.0 }
 0x1d1   :  { %v282_v30 = vadd.f32 %v280_v29, %v187_v28 }
 0x1d3   :  { %284 = vst [vmem:[#allocation11 + $0x8] sm:$0xff] %v282_v30 }
 0x1d4   :  { %297 = dma.vmem_to_hbm [thread:$0]  %s290_s29, 256, %s292_s9, [#allocation4], %s474_s1, %s474_s1, %s475_s16  }
 0x1d5   :  { %468 = dma.done.wait [#allocation4], 256  }
 0x1d6   :  { %469 = vsyncadd [#allocation4], 4294967040 }
 0x1d7   :  { %302 = vsyncpa [#allocation3], 1 }
 0x1d8   :  { %303 = vsyncpa [#allocation6], 1 }
 0x1d9   :  { %304 = vsyncpa [#allocation9], 1 }
 0x1da   :  { %305 = vsyncpa [#allocation4], 1 }

</bundles_post_ra>
